<compile_context>
chip_gen: v7x
topology: tpu7x:2x2x1
jax: 0.10.0
libtpu: 0.0.40
codegen_flags: <defaults>
</compile_context>

<pallas_src>
import jax
import jax.numpy as jnp
from jax.experimental import pallas as pl
from jax.experimental.pallas import tpu as pltpu

NUM_CLASSES = 18   # FocalLoss.forward hard-codes torch.eye(18)
GAMMA = 2          # python int => (1 - p) ** GAMMA lowers to multiplies (no pow)
ALPHA = 0.25       # forward() requires a numeric alpha; deterministic constant here


def _round_up(x, m):
    return (x + m - 1) // m * m


def _lane_fold(v):
    """(1, T) f32 with T a multiple of 128 -> (1, 128) per-lane partial sums.

    Pairwise tree while halves stay 128-lane aligned, then a short sequential
    fold for odd multiples of 128. Every slice is vreg-aligned (no relayout).
    """
    t = v.shape[1]
    while t >= 256 and t % 256 == 0:
        half = t // 2
        v = v[:, :half] + v[:, half:]
        t = half
    if t > 128:
        acc = v[:, :128]
        for k in range(1, t // 128):
            acc = acc + v[:, k * 128:(k + 1) * 128]
        return acc
    return v


def _focal_loss_kernel(x_ref, t_ref, out_ref):
    i = pl.program_id(1)                       # inner ("arbitrary") reduction axis

    @pl.when(i == 0)
    def _():
        out_ref[...] = jnp.zeros_like(out_ref)  # per-core resident accumulator

    x = x_ref[...].astype(jnp.float32)          # (C, TILE): rows lane-dense, classes on sublanes
    t = t_ref[...]                              # (1, TILE) int32, padding columns hold -1

    # numerically-stable softmax over the class (sublane) axis; only the
    # denominator needs the full 18-wide exp.
    m = jnp.max(x, axis=0, keepdims=True)       # (1, TILE)
    e = jnp.exp(x - m)                          # the only full-width transcendental
    denom = jnp.sum(e, axis=0, keepdims=True)   # (1, TILE)

    # select exp(x_target - m) per column with a compare + where (VPU only, no MXU)
    cls = jax.lax.broadcasted_iota(jnp.int32, x.shape, 0)     # (C, TILE)
    e_t = jnp.sum(jnp.where(cls == t, e, 0.0), axis=0, keepdims=True)

    # softmax at the target class; approx reciprocal lands on the idle EUP slot
    inv = pl.reciprocal(denom, approx=True)
    p_t = e_t * inv + 1e-9
    fl = ALPHA * ((1.0 - p_t) ** GAMMA) * (-jnp.log(p_t))     # one log per row

    # wrapper pads with target = -1, so the (1, TILE) target row alone identifies
    # padded / invalid columns (no per-tile iota needed); jnp.where keeps any
    # NaN/Inf from the padded columns out of the accumulator.
    valid = (t >= 0) & (t < NUM_CLASSES)
    fl = jnp.where(valid, fl, 0.0)

    out_ref[...] += _lane_fold(fl).reshape(out_ref.shape)     # (1, 1, 128) per-lane partials


def focal_loss(logits, targets, *, tile_rows=32768):
    """logits: (N, 18) float (f32 or bf16), targets: (N,) int class ids -> scalar loss."""
    n, c = logits.shape
    assert c == NUM_CLASSES, "FocalLoss.forward hard-codes 18 classes (torch.eye(18))"
    assert tile_rows % 128 == 0

    # Lane-dense layout: rows on the 128-lane axis, classes on sublanes.
    n128 = _round_up(n, 128)
    tile = min(tile_rows, n128)
    total_tiles = pl.cdiv(n128, tile)

    # Split the row range across 2 TensorCores (v7x megacore); on v5e/v6e the
    # leading axis just iterates serially and costs nothing.
    num_splits = 2 if total_tiles >= 2 else 1
    tiles_per_core = pl.cdiv(total_tiles, num_splits)
    n_pad = num_splits * tiles_per_core * tile   # bounded padding (<= 2 tiles), never O(N)

    # Keep the source dtype through the transpose (cast to f32 happens in-kernel);
    # pad logits with zeros and targets with -1 so padded columns self-mask.
    x_t = jnp.pad(logits.T, ((0, 0), (0, n_pad - n)))
    t_row = jnp.pad(targets.astype(jnp.int32).reshape(1, n),
                    ((0, 0), (0, n_pad - n)), constant_values=-1)

    col_map = lambda cc, i: (0, cc * tiles_per_core + i)
    partials = pl.pallas_call(
        _focal_loss_kernel,
        out_shape=jax.ShapeDtypeStruct((num_splits, 1, 128), jnp.float32),
        grid_spec=pltpu.PrefetchScalarGridSpec(
            num_scalar_prefetch=0,
            grid=(num_splits, tiles_per_core),
            in_specs=[
                pl.BlockSpec((NUM_CLASSES, tile), col_map),    # logits.T tile
                pl.BlockSpec((1, tile), col_map),              # targets tile
            ],
            out_specs=pl.BlockSpec((1, 1, 128), lambda cc, i: (cc, 0, 0)),
        ),
        compiler_params=pltpu.CompilerParams(
            dimension_semantics=("parallel", "arbitrary"),
            vmem_limit_bytes=32 * 1024 * 1024,   # 32 MiB: lets v5e take the 32K-row tile
        ),
    )(x_t, t_row)

    # per-core / per-lane partial sums -> scalar mean (reduced_fl.mean())
    return jnp.sum(partials) / jnp.float32(n)


def focal_loss_ref(logits, targets):
    # pure-JAX reference mirroring the PyTorch forward, for sanity checking
    onehot = jnp.eye(NUM_CLASSES, dtype=jnp.float32)[targets]
    p = jax.nn.softmax(logits.astype(jnp.float32), axis=1) + 1e-9
    ce = onehot * (-jnp.log(p))
    weight = onehot * (1.0 - p) ** GAMMA
    fl = ALPHA * weight * ce
    return jnp.sum(fl, axis=1).mean()


if __name__ == "__main__":
    key = jax.random.PRNGKey(0)
    k1, k2 = jax.random.split(key)

    # Tolerances are relaxed vs. v1 because the kernel uses the EUP approximate
    # reciprocal for the softmax denominator (~1e-4 relative on -log(p_t)).
    RTOL, ATOL = 5e-3, 5e-4

    # small demo shape (single tile, num_splits=1 path)
    N = 8
    logits = jax.random.normal(k1, (N, NUM_CLASSES), dtype=jnp.float32)
    targets = jax.random.randint(k2, (N,), 0, NUM_CLASSES, dtype=jnp.int32)

    out = jax.block_until_ready(focal_loss(logits, targets))
    ref = jax.block_until_ready(focal_loss_ref(logits, targets))
    assert jnp.allclose(out, ref, rtol=RTOL, atol=ATOL), (out, ref)

    # exercise the 2-way core split, multi-tile grid and remainder-row masking
    N2 = 300
    k3, k4 = jax.random.split(k2)
    logits2 = jax.random.normal(k3, (N2, NUM_CLASSES), dtype=jnp.float32)
    targets2 = jax.random.randint(k4, (N2,), 0, NUM_CLASSES, dtype=jnp.int32)
    out2 = jax.block_until_ready(focal_loss(logits2, targets2, tile_rows=128))
    ref2 = jax.block_until_ready(focal_loss_ref(logits2, targets2))
    assert jnp.allclose(out2, ref2, rtol=RTOL, atol=ATOL), (out2, ref2)

    print("KERNEL_OK")
</pallas_src>

<mosaic_0001>
module attributes {stable_mosaic.version = 11 : i64} {
  func.func @_focal_loss_kernel(%arg0: i32, %arg1: i32, %arg2: memref<18x128xf32, #tpu.memory_space<vmem>>, %arg3: memref<1x128xi32, #tpu.memory_space<vmem>>, %arg4: memref<1x1x128xf32, #tpu.memory_space<vmem>>) attributes {dimension_semantics = [#tpu.dimension_semantics<parallel>, #tpu.dimension_semantics<arbitrary>], iteration_bounds = array<i64: 1, 1>, scalar_prefetch = 0 : i64, scratch_operands = 0 : i64, tpu.core_type = #tpu.core_type<tc>, window_params = [{transform_indices = @transform_0, window_bounds = array<i64: 18, 128>}, {transform_indices = @transform_1, window_bounds = array<i64: 1, 128>}, {transform_indices = @transform_2, window_bounds = array<i64: 1, 1, 128>}]} {
    %c0_i32 = arith.constant 0 : i32
    %0 = arith.cmpi eq, %arg1, %c0_i32 : i32
    %1 = arith.extui %0 : i1 to i32
    %c0_i32_0 = arith.constant 0 : i32
    %2 = arith.cmpi ne, %1, %c0_i32_0 : i32
    scf.if %2 {
      %cst_19 = arith.constant 0.000000e+00 : f32
      %43 = vector.broadcast %cst_19 : f32 to vector<1x1x128xf32>
      %c0_20 = arith.constant 0 : index
      %c0_21 = arith.constant 0 : index
      %c0_22 = arith.constant 0 : index
      %44 = vector.load %arg4[%c0_20, %c0_21, %c0_22] : memref<1x1x128xf32, #tpu.memory_space<vmem>>, vector<1x1x128xf32>
      tpu.vector_store %arg4[%c0_20, %c0_21, %c0_22], %43 {strides = array<i32>} : memref<1x1x128xf32, #tpu.memory_space<vmem>>, vector<1x1x128xf32>,
    } else {
    }
    %c0 = arith.constant 0 : index
    %c0_1 = arith.constant 0 : index
    %3 = vector.load %arg2[%c0, %c0_1] : memref<18x128xf32, #tpu.memory_space<vmem>>, vector<18x128xf32>
    %c0_2 = arith.constant 0 : index
    %c0_3 = arith.constant 0 : index
    %4 = vector.load %arg3[%c0_2, %c0_3] : memref<1x128xi32, #tpu.memory_space<vmem>>, vector<1x128xi32>
    %cst = arith.constant dense<0xFF800000> : vector<128xf32>
    %5 = vector.multi_reduction <maximumf>, %3, %cst [0] : vector<18x128xf32> to vector<128xf32>
    %6 = vector.shape_cast %5 : vector<128xf32> to vector<1x128xf32>
    %7 = vector.broadcast %6 : vector<1x128xf32> to vector<18x128xf32>
    %8 = arith.subf %3, %7 : vector<18x128xf32>
    %9 = math.exp %8 : vector<18x128xf32>
    %cst_4 = arith.constant dense<0.000000e+00> : vector<128xf32>
    %10 = vector.multi_reduction <add>, %9, %cst_4 [0] : vector<18x128xf32> to vector<128xf32>
    %11 = vector.shape_cast %10 : vector<128xf32> to vector<1x128xf32>
    %12 = tpu.iota {dimensions = array<i32: 0>} : vector<18x128xi32>
    %13 = vector.broadcast %4 : vector<1x128xi32> to vector<18x128xi32>
    %14 = arith.cmpi eq, %12, %13 : vector<18x128xi32>
    %cst_5 = arith.constant 0.000000e+00 : f32
    %15 = vector.broadcast %cst_5 : f32 to vector<18x128xf32>
    %16 = arith.select %14, %9, %15 : vector<18x128xi1>, vector<18x128xf32>
    %cst_6 = arith.constant dense<0.000000e+00> : vector<128xf32>
    %17 = vector.multi_reduction <add>, %16, %cst_6 [0] : vector<18x128xf32> to vector<128xf32>
    %18 = vector.shape_cast %17 : vector<128xf32> to vector<1x128xf32>
    %19 = tpu.reciprocal %11 {approx = true} : vector<1x128xf32> -> vector<1x128xf32>
    %20 = arith.mulf %18, %19 : vector<1x128xf32>
    %cst_7 = arith.constant 9.99999971E-10 : f32
    %21 = vector.broadcast %cst_7 : f32 to vector<1x128xf32>
    %22 = arith.addf %20, %21 : vector<1x128xf32>
    %cst_8 = arith.constant 1.000000e+00 : f32
    %23 = vector.broadcast %cst_8 : f32 to vector<1x128xf32>
    %24 = arith.subf %23, %22 : vector<1x128xf32>
    %25 = arith.mulf %24, %24 : vector<1x128xf32>
    %cst_9 = arith.constant 2.500000e-01 : f32
    %26 = vector.broadcast %cst_9 : f32 to vector<1x128xf32>
    %27 = arith.mulf %26, %25 : vector<1x128xf32>
    %28 = math.log %22 : vector<1x128xf32>
    %cst_10 = arith.constant 0.000000e+00 : f32
    %29 = vector.broadcast %cst_10 : f32 to vector<1x128xf32>
    %30 = arith.subf %29, %28 : vector<1x128xf32>
    %31 = arith.mulf %27, %30 : vector<1x128xf32>
    %c0_i32_11 = arith.constant 0 : i32
    %32 = vector.broadcast %c0_i32_11 : i32 to vector<1x128xi32>
    %33 = arith.cmpi sge, %4, %32 : vector<1x128xi32>
    %c18_i32 = arith.constant 18 : i32
    %34 = vector.broadcast %c18_i32 : i32 to vector<1x128xi32>
    %35 = arith.cmpi slt, %4, %34 : vector<1x128xi32>
    %36 = arith.andi %33, %35 : vector<1x128xi1>
    %cst_12 = arith.constant 0.000000e+00 : f32
    %37 = vector.broadcast %cst_12 : f32 to vector<1x128xf32>
    %38 = arith.select %36, %31, %37 : vector<1x128xi1>, vector<1x128xf32>
    %c0_13 = arith.constant 0 : index
    %c0_14 = arith.constant 0 : index
    %c0_15 = arith.constant 0 : index
    %39 = vector.load %arg4[%c0_13, %c0_14, %c0_15] : memref<1x1x128xf32, #tpu.memory_space<vmem>>, vector<1x1x128xf32>
    %40 = vector.shape_cast %38 : vector<1x128xf32> to vector<1x1x128xf32>
    %41 = arith.addf %39, %40 : vector<1x1x128xf32>
    %c0_16 = arith.constant 0 : index
    %c0_17 = arith.constant 0 : index
    %c0_18 = arith.constant 0 : index
    %42 = vector.load %arg4[%c0_16, %c0_17, %c0_18] : memref<1x1x128xf32, #tpu.memory_space<vmem>>, vector<1x1x128xf32>
    tpu.vector_store %arg4[%c0_16, %c0_17, %c0_18], %41 {strides = array<i32>} : memref<1x1x128xf32, #tpu.memory_space<vmem>>, vector<1x1x128xf32>,
    return
  }
  func.func @transform_0(%arg0: i32, %arg1: i32) -> (i32, i32) {
    %c1_i32 = arith.constant 1 : i32
    %0 = arith.muli %arg0, %c1_i32 : i32
    %1 = arith.addi %0, %arg1 : i32
    %c0_i32 = arith.constant 0 : i32
    %c0_i32_0 = arith.constant 0 : i32
    return %c0_i32, %1 : i32, i32
  }
  func.func @transform_1(%arg0: i32, %arg1: i32) -> (i32, i32) {
    %c1_i32 = arith.constant 1 : i32
    %0 = arith.muli %arg0, %c1_i32 : i32
    %1 = arith.addi %0, %arg1 : i32
    %c0_i32 = arith.constant 0 : i32
    %c0_i32_0 = arith.constant 0 : i32
    return %c0_i32, %1 : i32, i32
  }
  func.func @transform_2(%arg0: i32, %arg1: i32) -> (i32, i32, i32) {
    %c0_i32 = arith.constant 0 : i32
    %c0_i32_0 = arith.constant 0 : i32
    %c0_i32_1 = arith.constant 0 : i32
    return %arg0, %c0_i32, %c0_i32_0 : i32, i32, i32
  }
}

</mosaic_0001>

<bundles_post_ra>
// kernel: tpu_custom_call.1
= control target key start
LH: loop header
LB: loop body
LE: loop exit
PB: predicated region body
PF: predicated region fallthrough
CT: control target
= control target key end

     0   :  { %7 = vsyncpa [#allocation3], 0  ;;  %s252_s0 = inlined_call_operand.hbm [shape: f32[18,128], index: 0, kind: input, shape index: {}]   ;;  %s253_s1 = inlined_call_operand.vmem [shape: s32[1,128], index: 1, kind: input, shape index: {}]   ;;  %s254_s2 = inlined_call_operand.hbm [shape: f32[1,1,128], index: 2, kind: output, shape index: {}]  }
   0x1   :  { %8 = vsyncpa [#allocation4], 0  ;;  %s202_s9 = smov [#allocation2]   ;;  %s154_s13 = scalar_lea.hbm %s252_s0, 384 }
   0x2   :  { %s17_s10 = sshll.u32 %s202_s9, 4  ;;  %p155_p0 = scmp.ne.s32.totalorder %s252_s0, %s154_s13  ;;  %s18_s10 = int_to_ptr.vmem [resolvable:$true] %s17_s10 }
   0x3   :  { %p158_p1 = scmp.lt.u32.totalorder %s154_s13, %s252_s0 }
   0x5   :  { %p160_p2 = pnand %p158_p1, %p155_p0 }
   0x7   :  { %163 = shalt.err (!%p160_p2)
}
   0x8   :  { %s164_s18 = scalar_lea.vmem %s18_s10, 384  ;;  %p169_p4 = scmp.lt.s32.totalorder %s18_s10, %s18_s10 }
   0x9   :  { %p165_p3 = scmp.ne.s32.totalorder %s18_s10, %s164_s18  ;;  %p170_p5 = scmp.lt.s32.totalorder %s164_s18, %s164_s18 }
   0xb   :  { %p171_p6 = por %p170_p5, %p169_p4 }
   0xd   :  { %p172_p7 = pnand %p171_p6, %p165_p3 }
   0xf   :  { %175 = shalt.err (!%p172_p7)
}
  0x10   :  { %s203_s19 = smov 128   ;;  %s204_s20 = smov 8  }
  0x11   :  { %23 = dma.hbm_to_vmem [thread:$0]  %s252_s0, 384, %s18_s10, [#allocation3], %s203_s19, %s203_s19, %s204_s20  }
  0x12   :  { %198 = dma.done.wait [#allocation3], 384  }
  0x13   :  { %199 = vsyncadd [#allocation3], 4294966912  ;;  %v205_v0 = vmov 0.0   ;;  %vm53_vm0 = vcmask 1041408   ;;  %v49_v1 = vld [vmem:[#allocation2] sm:$0xff]  ;;  %v50_v2 = vld [vmem:[#allocation2 + $0x8] sm:$0xff]  ;;  %v81_v12 = vlaneseq }
  0x14   :  { %48 = vst [vmem:[#allocation5] sm:$0x1] %v205_v0  ;;  %v51_v3 = vld [vmem:[#allocation2 + $0x10] sm:$0x3]  ;;  %v55_v5 = vmax.f32 %v49_v1, %v50_v2  ;;  %v52_v22 = vld [vmem:[%s253_s1] sm:$0x1] }
  0x15   :  { %v54_v4 = vsel %vm53_vm0, %v51_v3, -inf  ;;  %v82_v17 = vshrl.u32 %v81_v12, 7  ;;  %vm114_vm4 = vcmp.ge.s32.totalorder %v52_v22, 0  ;;  %vm115_vm5 = vcmp.lt.s32.totalorder %v52_v22, 18  ;;  %s206_s1 = smov [#allocation5]  }
  0x16   :  { %v56_v6 = vmax.f32 %v55_v5, %v54_v4  ;;  %vm116_vm6 = vmand %vm114_vm4, %vm115_vm5  ;;  %s127_s24 = sshll.u32 %s206_s1, 4  ;;  %s128_s24 = int_to_ptr.vmem [resolvable:$true] %s127_s24 }
  0x17   :  { %v87_v21 = vsub.s32 0, %v82_v17  ;;  %v83_v24 = vadd.s32 8, %v82_v17  ;;  %v84_v25 = vadd.s32 16, %v82_v17  ;;  %s176_s25 = scalar_lea.vmem %s128_s24, 16  ;;  %s180_s26 = scalar_lea.vmem %s128_s24, 32 }
  0x18   :  { %v57_v7 = vrot.slane %v56_v6, 4  ;;  %p177_p8 = scmp.ne.s32.totalorder %s128_s24, %s176_s25  ;;  %p181_p9 = scmp.lt.s32.totalorder %s128_s24, %s128_s24 }
  0x19   :  { %v88_v23 = vrot.slane %v52_v22, %v87_v21  ;;  %p182_p10 = scmp.lt.s32.totalorder %s180_s26, %s176_s25 }
  0x1a   :  { %v58_v8 = vmax.f32 %v56_v6, %v57_v7 }
  0x1b   :  { %vm89_vm1 = vcmp.eq.s32.totalorder %v82_v17, %v88_v23  ;;  %vm90_vm2 = vcmp.eq.s32.totalorder %v83_v24, %v88_v23  ;;  %vm91_vm3 = vcmp.eq.s32.totalorder %v84_v25, %v88_v23  ;;  %v118_v60 = vld [vmem:[#allocation5] sm:$0x1]  ;;  %p183_p11 = por %p182_p10, %p181_p9 }
  0x1c   :  { %v59_v9 = vrot.slane %v58_v8, 2 }
  0x1d   :  { %p184_p12 = pnand %p183_p11, %p177_p8 }
  0x1e   :  { %v60_v10 = vmax.f32 %v58_v8, %v59_v9 }
  0x20   :  { %v61_v11 = vrot.slane %v60_v10, 1 }
  0x22   :  { %v62_v13 = vmax.f32 %v60_v10, %v61_v11 }
  0x24   :  { %v63_v14 = vsub.f32 %v49_v1, %v62_v13  ;;  %v64_v15 = vsub.f32 %v50_v2, %v62_v13  ;;  %v65_v16 = vsub.f32 %v51_v3, %v62_v13 }
  0x26   :  { %v66_v18 = vmul.f32 1.442695, %v63_v14  ;;  %v68_v19 = vmul.f32 1.442695, %v64_v15  ;;  %v70_v20 = vmul.f32 1.442695, %v65_v16 }
  0x28   :  { %144 = vpow2.f32 %v66_v18 }
  0x29   :  { %146 = vpow2.f32 %v68_v19 }
  0x2a   :  { %148 = vpow2.f32 %v70_v20 }
  0x32   :  { %v145_v26 = vpop.eup %144 }
  0x33   :  { %v147_v27 = vpop.eup %146  ;;  %v92_v28 = vsel %vm89_vm1, %v145_v26, 0.0 }
  0x34   :  { %v149_v29 = vpop.eup %148  ;;  %v72_v30 = vadd.f32 %v147_v27, %v145_v26  ;;  %v93_v31 = vsel %vm90_vm2, %v147_v27, 0.0 }
  0x35   :  { %v73_v32 = vsel %vm53_vm0, %v149_v29, 0.0  ;;  %v94_v33 = vsel %vm91_vm3, %v149_v29, 0.0  ;;  %v95_v34 = vadd.f32 %v93_v31, %v92_v28 }
  0x36   :  { %v74_v35 = vadd.f32 %v73_v32, %v72_v30  ;;  %v96_v36 = vsel %vm53_vm0, %v94_v33, 0.0 }
  0x37   :  { %v97_v37 = vadd.f32 %v96_v36, %v95_v34 }
  0x38   :  { %v75_v38 = vrot.slane %v74_v35, 4 }
  0x39   :  { %v98_v39 = vrot.slane %v97_v37, 4 }
  0x3a   :  { %v76_v40 = vadd.f32 %v75_v38, %v74_v35 }
  0x3b   :  { %v99_v41 = vadd.f32 %v98_v39, %v97_v37 }
  0x3c   :  { %v77_v42 = vrot.slane %v76_v40, 2 }
  0x3d   :  { %v100_v44 = vrot.slane %v99_v41, 2 }
  0x3e   :  { %v78_v43 = vadd.f32 %v77_v42, %v76_v40 }
  0x3f   :  { %v101_v47 = vadd.f32 %v100_v44, %v99_v41 }
  0x40   :  { %v79_v45 = vrot.slane %v78_v43, 1 }
  0x41   :  { %v102_v48 = vrot.slane %v101_v47, 1 }
  0x42   :  { %v80_v46 = vadd.f32 %v79_v45, %v78_v43 }
  0x43   :  { %v103_v49 = vadd.f32 %v102_v48, %v101_v47 }
  0x44   :  { %150 = vrcp.f32 %v80_v46 }
  0x4e   :  { %v151_v50 = vpop.eup %150 }
  0x4f   :  { %v105_v51 = vmul.f32 %v151_v50, %v103_v49 }
  0x51   :  { %v106_v52 = vadd.f32 1e-09, %v105_v51 }
  0x53   :  { %152 = vlog2.f32 %v106_v52  ;;  %v107_v53 = vsub.f32 1.0, %v106_v52 }
  0x55   :  { %v108_v54 = vmul.f32 %v107_v53, %v107_v53 }
  0x57   :  { %v109_v56 = vmul.f32 0.25, %v108_v54 }
  0x5d   :  { %v153_v55 = vpop.eup %152 }
  0x5e   :  { %v111_v57 = vmul.f32 0.6931472, %v153_v55 }
  0x60   :  { %v112_v58 = vsub.f32 0.0, %v111_v57 }
  0x62   :  { %v113_v59 = vmul.f32 %v112_v58, %v109_v56 }
  0x64   :  { %v117_v61 = vsel %vm116_vm6, %v113_v59, 0.0 }
  0x65   :  { %v119_v62 = vadd.f32 %v118_v60, %v117_v61 }
  0x67   :  { %120 = vst [vmem:[#allocation5] sm:$0x1] %v119_v62 }
  0x68   :  { %187 = shalt.err (!%p184_p12)
}
  0x69   :  { %s188_s29 = scalar_lea.hbm %s254_s2, 16 }
  0x6a   :  { %p189_p13 = scmp.ne.s32.totalorder %s254_s2, %s188_s29  ;;  %p192_p0 = scmp.lt.u32.totalorder %s188_s29, %s254_s2 }
  0x6c   :  { %p194_p1 = pnand %p192_p0, %p189_p13 }
  0x6e   :  { %197 = shalt.err (!%p194_p1)
}
  0x6f   :  { %130 = dma.vmem_to_hbm [thread:$0]  %s128_s24, 16, %s254_s2, [#allocation4]  }
  0x70   :  { %200 = dma.done.wait [#allocation4], 16  }
  0x71   :  { %201 = vsyncadd [#allocation4], 4294967280 }
  0x72   :  { %134 = vsyncpa [#allocation3], 1 }
  0x73   :  { %135 = vsyncpa [#allocation4], 1 }

</bundles_post_ra>
